<compile_context>
chip_gen: v5e
topology: v5e:2x2
jax: 0.10.0
libtpu: 0.0.40
codegen_flags: <defaults>
</compile_context>

<pallas_src>
import jax
import jax.numpy as jnp
from jax.experimental import pallas as pl
from jax.experimental.pallas import tpu as pltpu

_LANE = 128
_SLAB = 8  # sublane rows per inner slab -> one (8, 128) f32 vreg per plane

# Flat offsets of each parameter inside the packed 1-D SMEM table (87 floats).
_W1, _B1 = 0, 48        # w1: (6, 8) row-major
_W2, _B2 = 54, 78       # w2: (4, 6) row-major
_W3, _B3 = 82, 86       # w3: (1, 4) row-major
_N_PARAMS = 87


def _sigmoid(a):
    # sigmoid(a) == 0.5 * tanh(0.5 * a) + 0.5 ; tanh runs on the EUP slot.
    return 0.5 * jnp.tanh(0.5 * a) + 0.5


def _mlp_kernel(wb_ref, x_ref, o_ref):
    """wb_ref: (87,) f32 SMEM.  x_ref: (8, TR, 128) f32 VMEM.  o_ref: (TR, 128)."""
    n_slabs = o_ref.shape[0] // _SLAB

    # Hoist all parameter scalars out of the slab loop (one SMEM read each).
    w = [wb_ref[i] for i in range(_N_PARAMS)]

    # Fully unrolled (static) slab loop: every intermediate plane stays in vregs.
    for s in range(n_slabs):
        r = s * _SLAB
        xp = [x_ref[k, pl.ds(r, _SLAB), :] for k in range(8)]   # 8 vregs

        # Layer 1: 8 -> 6, scalar(SMEM) * vreg MACs.
        hp = []
        for j in range(6):
            a = w[_W1 + 8 * j] * xp[0]
            for k in range(1, 8):
                a = a + w[_W1 + 8 * j + k] * xp[k]
            hp.append(_sigmoid(a + w[_B1 + j]))

        # Layer 2: 6 -> 4.
        gp = []
        for j in range(4):
            a = w[_W2 + 6 * j] * hp[0]
            for k in range(1, 6):
                a = a + w[_W2 + 6 * j + k] * hp[k]
            gp.append(_sigmoid(a + w[_B2 + j]))

        # Layer 3: 4 -> 1.
        a = w[_W3] * gp[0]
        for k in range(1, 4):
            a = a + w[_W3 + k] * gp[k]
        y = _sigmoid(a + w[_B3])

        o_ref[pl.ds(r, _SLAB), :] = y.astype(o_ref.dtype)       # one lane-dense store


def _cdiv(a, b):
    return -(-a // b)


def _round_up(n, m):
    return ((n + m - 1) // m) * m


def pack_params(params):
    """Flatten all weights/biases (PyTorch convention) into one 1-D f32 table."""
    return jnp.concatenate([
        params["w1"].reshape(-1), params["b1"].reshape(-1),
        params["w2"].reshape(-1), params["b2"].reshape(-1),
        params["w3"].reshape(-1), params["b3"].reshape(-1),
    ]).astype(jnp.float32)


def mlp_forward(x, params, block_rows=128):
    """x: (B, 8) f32 -> (B, 1) f32, equivalent to sigmoid(Linear) x3 (8->6->4->1).

    block_rows = 128-lane batch rows per grid step (default 128 -> 16384 batch
    elements / ~512 KiB input block per step; keeps double-buffered VMEM tiny on
    all of v5e/v6e/v7x while amortizing the ~0.35 us per-step overhead).
    """
    B = x.shape[0]
    rows = _cdiv(B, _LANE)                         # 128-wide batch rows needed

    # Rows per grid step: multiple of _SLAB, capped by available work, and when
    # possible split so the "parallel" axis has >= 2 steps (v7x has 2 TCs).
    tr = min(block_rows, _round_up(rows, _SLAB))
    if rows > _SLAB and rows <= tr:
        tr = _cdiv(rows, 2)
    tr = _round_up(max(tr, _SLAB), _SLAB)

    R = _round_up(rows, tr)                        # padded row count
    Bp = R * _LANE

    # SoA layout: feature-major, batch fills sublanes *and* lanes.
    # TODO(synk): upstream producers could hand x over feature-major to avoid this
    # wrapper-side transpose+pad HBM pass (matters most on v5e).
    xt = (jnp.zeros((8, Bp), jnp.float32)
          .at[:, :B].set(x.astype(jnp.float32).T)
          .reshape(8, R, _LANE))
    wb = pack_params(params)

    out = pl.pallas_call(
        _mlp_kernel,
        out_shape=jax.ShapeDtypeStruct((R, _LANE), jnp.float32),
        grid=(R // tr,),
        in_specs=[
            pl.BlockSpec(memory_space=pltpu.MemorySpace.SMEM),   # weight table
            pl.BlockSpec((8, tr, _LANE), lambda i: (0, i, 0)),   # x tile, pipelined
        ],
        out_specs=pl.BlockSpec((tr, _LANE), lambda i: (i, 0)),
        compiler_params=pltpu.CompilerParams(dimension_semantics=("parallel",)),
    )(wb, xt)

    return out.reshape(-1)[:B].reshape(B, 1)


def init_params(key):
    """Deterministic init matching nn.Linear shapes: W (out_f, in_f), b (out_f,)."""
    ks = jax.random.split(key, 6)

    def lin(kw, kb, in_f, out_f):
        bound = 1.0 / jnp.sqrt(in_f)
        wgt = jax.random.uniform(kw, (out_f, in_f), jnp.float32, -bound, bound)
        bias = jax.random.uniform(kb, (out_f,), jnp.float32, -bound, bound)
        return wgt, bias

    w1, b1 = lin(ks[0], ks[1], 8, 6)
    w2, b2 = lin(ks[2], ks[3], 6, 4)
    w3, b3 = lin(ks[4], ks[5], 4, 1)
    return {"w1": w1, "b1": b1, "w2": w2, "b2": b2, "w3": w3, "b3": b3}


def reference_forward(x, params):
    hi = jax.lax.Precision.HIGHEST
    h1 = jax.nn.sigmoid(jnp.dot(x, params["w1"].T, precision=hi) + params["b1"])
    h2 = jax.nn.sigmoid(jnp.dot(h1, params["w2"].T, precision=hi) + params["b2"])
    return jax.nn.sigmoid(jnp.dot(h2, params["w3"].T, precision=hi) + params["b3"])


if __name__ == "__main__":
    key = jax.random.PRNGKey(0)
    kx, kp = jax.random.split(key)
    params = init_params(kp)

    # (B=8,    default tile) : tiny batch, single grid step, heavy padding path.
    # (B=300,  default tile) : ragged batch inside one tile (lane/row padding).
    # (B=2048, block_rows=8) : exercises a multi-step pipelined grid.
    for B, br in ((8, 128), (300, 128), (2048, 8)):
        x = jax.random.normal(jax.random.fold_in(kx, B), (B, 8), jnp.float32)
        y = jax.block_until_ready(mlp_forward(x, params, block_rows=br))
        y_ref = reference_forward(x, params)
        assert y.shape == (B, 1)
        assert jnp.allclose(y, y_ref, atol=1e-5, rtol=1e-5), float(
            jnp.max(jnp.abs(y - y_ref))
        )

    print("KERNEL_OK")
</pallas_src>

<mosaic_0001>
module attributes {stable_mosaic.version = 11 : i64} {
  func.func @_mlp_kernel(%arg0: i32, %arg1: memref<87xf32, #tpu.memory_space<smem>>, %arg2: memref<8x8x128xf32, #tpu.memory_space<vmem>>, %arg3: memref<8x128xf32, #tpu.memory_space<vmem>>) attributes {dimension_semantics = [#tpu.dimension_semantics<parallel>], iteration_bounds = array<i64: 1>, scalar_prefetch = 0 : i64, scratch_operands = 0 : i64, tpu.core_type = #tpu.core_type<tc>, window_params = [{transform_indices = @transform_0, window_bounds = array<i64: 87>}, {transform_indices = @transform_1, window_bounds = array<i64: 8, 8, 128>}, {transform_indices = @transform_2, window_bounds = array<i64: 8, 128>}]} {
    %c0 = arith.constant 0 : index
    %0 = memref.load %arg1[%c0] : memref<87xf32, #tpu.memory_space<smem>>
    %c1 = arith.constant 1 : index
    %1 = memref.load %arg1[%c1] : memref<87xf32, #tpu.memory_space<smem>>
    %c2 = arith.constant 2 : index
    %2 = memref.load %arg1[%c2] : memref<87xf32, #tpu.memory_space<smem>>
    %c3 = arith.constant 3 : index
    %3 = memref.load %arg1[%c3] : memref<87xf32, #tpu.memory_space<smem>>
    %c4 = arith.constant 4 : index
    %4 = memref.load %arg1[%c4] : memref<87xf32, #tpu.memory_space<smem>>
    %c5 = arith.constant 5 : index
    %5 = memref.load %arg1[%c5] : memref<87xf32, #tpu.memory_space<smem>>
    %c6 = arith.constant 6 : index
    %6 = memref.load %arg1[%c6] : memref<87xf32, #tpu.memory_space<smem>>
    %c7 = arith.constant 7 : index
    %7 = memref.load %arg1[%c7] : memref<87xf32, #tpu.memory_space<smem>>
    %c8 = arith.constant 8 : index
    %8 = memref.load %arg1[%c8] : memref<87xf32, #tpu.memory_space<smem>>
    %c9 = arith.constant 9 : index
    %9 = memref.load %arg1[%c9] : memref<87xf32, #tpu.memory_space<smem>>
    %c10 = arith.constant 10 : index
    %10 = memref.load %arg1[%c10] : memref<87xf32, #tpu.memory_space<smem>>
    %c11 = arith.constant 11 : index
    %11 = memref.load %arg1[%c11] : memref<87xf32, #tpu.memory_space<smem>>
    %c12 = arith.constant 12 : index
    %12 = memref.load %arg1[%c12] : memref<87xf32, #tpu.memory_space<smem>>
    %c13 = arith.constant 13 : index
    %13 = memref.load %arg1[%c13] : memref<87xf32, #tpu.memory_space<smem>>
    %c14 = arith.constant 14 : index
    %14 = memref.load %arg1[%c14] : memref<87xf32, #tpu.memory_space<smem>>
    %c15 = arith.constant 15 : index
    %15 = memref.load %arg1[%c15] : memref<87xf32, #tpu.memory_space<smem>>
    %c16 = arith.constant 16 : index
    %16 = memref.load %arg1[%c16] : memref<87xf32, #tpu.memory_space<smem>>
    %c17 = arith.constant 17 : index
    %17 = memref.load %arg1[%c17] : memref<87xf32, #tpu.memory_space<smem>>
    %c18 = arith.constant 18 : index
    %18 = memref.load %arg1[%c18] : memref<87xf32, #tpu.memory_space<smem>>
    %c19 = arith.constant 19 : index
    %19 = memref.load %arg1[%c19] : memref<87xf32, #tpu.memory_space<smem>>
    %c20 = arith.constant 20 : index
    %20 = memref.load %arg1[%c20] : memref<87xf32, #tpu.memory_space<smem>>
    %c21 = arith.constant 21 : index
    %21 = memref.load %arg1[%c21] : memref<87xf32, #tpu.memory_space<smem>>
    %c22 = arith.constant 22 : index
    %22 = memref.load %arg1[%c22] : memref<87xf32, #tpu.memory_space<smem>>
    %c23 = arith.constant 23 : index
    %23 = memref.load %arg1[%c23] : memref<87xf32, #tpu.memory_space<smem>>
    %c24 = arith.constant 24 : index
    %24 = memref.load %arg1[%c24] : memref<87xf32, #tpu.memory_space<smem>>
    %c25 = arith.constant 25 : index
    %25 = memref.load %arg1[%c25] : memref<87xf32, #tpu.memory_space<smem>>
    %c26 = arith.constant 26 : index
    %26 = memref.load %arg1[%c26] : memref<87xf32, #tpu.memory_space<smem>>
    %c27 = arith.constant 27 : index
    %27 = memref.load %arg1[%c27] : memref<87xf32, #tpu.memory_space<smem>>
    %c28 = arith.constant 28 : index
    %28 = memref.load %arg1[%c28] : memref<87xf32, #tpu.memory_space<smem>>
    %c29 = arith.constant 29 : index
    %29 = memref.load %arg1[%c29] : memref<87xf32, #tpu.memory_space<smem>>
    %c30 = arith.constant 30 : index
    %30 = memref.load %arg1[%c30] : memref<87xf32, #tpu.memory_space<smem>>
    %c31 = arith.constant 31 : index
    %31 = memref.load %arg1[%c31] : memref<87xf32, #tpu.memory_space<smem>>
    %c32 = arith.constant 32 : index
    %32 = memref.load %arg1[%c32] : memref<87xf32, #tpu.memory_space<smem>>
    %c33 = arith.constant 33 : index
    %33 = memref.load %arg1[%c33] : memref<87xf32, #tpu.memory_space<smem>>
    %c34 = arith.constant 34 : index
    %34 = memref.load %arg1[%c34] : memref<87xf32, #tpu.memory_space<smem>>
    %c35 = arith.constant 35 : index
    %35 = memref.load %arg1[%c35] : memref<87xf32, #tpu.memory_space<smem>>
    %c36 = arith.constant 36 : index
    %36 = memref.load %arg1[%c36] : memref<87xf32, #tpu.memory_space<smem>>
    %c37 = arith.constant 37 : index
    %37 = memref.load %arg1[%c37] : memref<87xf32, #tpu.memory_space<smem>>
    %c38 = arith.constant 38 : index
    %38 = memref.load %arg1[%c38] : memref<87xf32, #tpu.memory_space<smem>>
    %c39 = arith.constant 39 : index
    %39 = memref.load %arg1[%c39] : memref<87xf32, #tpu.memory_space<smem>>
    %c40 = arith.constant 40 : index
    %40 = memref.load %arg1[%c40] : memref<87xf32, #tpu.memory_space<smem>>
    %c41 = arith.constant 41 : index
    %41 = memref.load %arg1[%c41] : memref<87xf32, #tpu.memory_space<smem>>
    %c42 = arith.constant 42 : index
    %42 = memref.load %arg1[%c42] : memref<87xf32, #tpu.memory_space<smem>>
    %c43 = arith.constant 43 : index
    %43 = memref.load %arg1[%c43] : memref<87xf32, #tpu.memory_space<smem>>
    %c44 = arith.constant 44 : index
    %44 = memref.load %arg1[%c44] : memref<87xf32, #tpu.memory_space<smem>>
    %c45 = arith.constant 45 : index
    %45 = memref.load %arg1[%c45] : memref<87xf32, #tpu.memory_space<smem>>
    %c46 = arith.constant 46 : index
    %46 = memref.load %arg1[%c46] : memref<87xf32, #tpu.memory_space<smem>>
    %c47 = arith.constant 47 : index
    %47 = memref.load %arg1[%c47] : memref<87xf32, #tpu.memory_space<smem>>
    %c48 = arith.constant 48 : index
    %48 = memref.load %arg1[%c48] : memref<87xf32, #tpu.memory_space<smem>>
    %c49 = arith.constant 49 : index
    %49 = memref.load %arg1[%c49] : memref<87xf32, #tpu.memory_space<smem>>
    %c50 = arith.constant 50 : index
    %50 = memref.load %arg1[%c50] : memref<87xf32, #tpu.memory_space<smem>>
    %c51 = arith.constant 51 : index
    %51 = memref.load %arg1[%c51] : memref<87xf32, #tpu.memory_space<smem>>
    %c52 = arith.constant 52 : index
    %52 = memref.load %arg1[%c52] : memref<87xf32, #tpu.memory_space<smem>>
    %c53 = arith.constant 53 : index
    %53 = memref.load %arg1[%c53] : memref<87xf32, #tpu.memory_space<smem>>
    %c54 = arith.constant 54 : index
    %54 = memref.load %arg1[%c54] : memref<87xf32, #tpu.memory_space<smem>>
    %c55 = arith.constant 55 : index
    %55 = memref.load %arg1[%c55] : memref<87xf32, #tpu.memory_space<smem>>
    %c56 = arith.constant 56 : index
    %56 = memref.load %arg1[%c56] : memref<87xf32, #tpu.memory_space<smem>>
    %c57 = arith.constant 57 : index
    %57 = memref.load %arg1[%c57] : memref<87xf32, #tpu.memory_space<smem>>
    %c58 = arith.constant 58 : index
    %58 = memref.load %arg1[%c58] : memref<87xf32, #tpu.memory_space<smem>>
    %c59 = arith.constant 59 : index
    %59 = memref.load %arg1[%c59] : memref<87xf32, #tpu.memory_space<smem>>
    %c60 = arith.constant 60 : index
    %60 = memref.load %arg1[%c60] : memref<87xf32, #tpu.memory_space<smem>>
    %c61 = arith.constant 61 : index
    %61 = memref.load %arg1[%c61] : memref<87xf32, #tpu.memory_space<smem>>
    %c62 = arith.constant 62 : index
    %62 = memref.load %arg1[%c62] : memref<87xf32, #tpu.memory_space<smem>>
    %c63 = arith.constant 63 : index
    %63 = memref.load %arg1[%c63] : memref<87xf32, #tpu.memory_space<smem>>
    %c64 = arith.constant 64 : index
    %64 = memref.load %arg1[%c64] : memref<87xf32, #tpu.memory_space<smem>>
    %c65 = arith.constant 65 : index
    %65 = memref.load %arg1[%c65] : memref<87xf32, #tpu.memory_space<smem>>
    %c66 = arith.constant 66 : index
    %66 = memref.load %arg1[%c66] : memref<87xf32, #tpu.memory_space<smem>>
    %c67 = arith.constant 67 : index
    %67 = memref.load %arg1[%c67] : memref<87xf32, #tpu.memory_space<smem>>
    %c68 = arith.constant 68 : index
    %68 = memref.load %arg1[%c68] : memref<87xf32, #tpu.memory_space<smem>>
    %c69 = arith.constant 69 : index
    %69 = memref.load %arg1[%c69] : memref<87xf32, #tpu.memory_space<smem>>
    %c70 = arith.constant 70 : index
    %70 = memref.load %arg1[%c70] : memref<87xf32, #tpu.memory_space<smem>>
    %c71 = arith.constant 71 : index
    %71 = memref.load %arg1[%c71] : memref<87xf32, #tpu.memory_space<smem>>
    %c72 = arith.constant 72 : index
    %72 = memref.load %arg1[%c72] : memref<87xf32, #tpu.memory_space<smem>>
    %c73 = arith.constant 73 : index
    %73 = memref.load %arg1[%c73] : memref<87xf32, #tpu.memory_space<smem>>
    %c74 = arith.constant 74 : index
    %74 = memref.load %arg1[%c74] : memref<87xf32, #tpu.memory_space<smem>>
    %c75 = arith.constant 75 : index
    %75 = memref.load %arg1[%c75] : memref<87xf32, #tpu.memory_space<smem>>
    %c76 = arith.constant 76 : index
    %76 = memref.load %arg1[%c76] : memref<87xf32, #tpu.memory_space<smem>>
    %c77 = arith.constant 77 : index
    %77 = memref.load %arg1[%c77] : memref<87xf32, #tpu.memory_space<smem>>
    %c78 = arith.constant 78 : index
    %78 = memref.load %arg1[%c78] : memref<87xf32, #tpu.memory_space<smem>>
    %c79 = arith.constant 79 : index
    %79 = memref.load %arg1[%c79] : memref<87xf32, #tpu.memory_space<smem>>
    %c80 = arith.constant 80 : index
    %80 = memref.load %arg1[%c80] : memref<87xf32, #tpu.memory_space<smem>>
    %c81 = arith.constant 81 : index
    %81 = memref.load %arg1[%c81] : memref<87xf32, #tpu.memory_space<smem>>
    %c82 = arith.constant 82 : index
    %82 = memref.load %arg1[%c82] : memref<87xf32, #tpu.memory_space<smem>>
    %c83 = arith.constant 83 : index
    %83 = memref.load %arg1[%c83] : memref<87xf32, #tpu.memory_space<smem>>
    %c84 = arith.constant 84 : index
    %84 = memref.load %arg1[%c84] : memref<87xf32, #tpu.memory_space<smem>>
    %c85 = arith.constant 85 : index
    %85 = memref.load %arg1[%c85] : memref<87xf32, #tpu.memory_space<smem>>
    %c86 = arith.constant 86 : index
    %86 = memref.load %arg1[%c86] : memref<87xf32, #tpu.memory_space<smem>>
    %c0_0 = arith.constant 0 : index
    %c0_1 = arith.constant 0 : index
    %c0_2 = arith.constant 0 : index
    %87 = vector.load %arg2[%c0_0, %c0_1, %c0_2] : memref<8x8x128xf32, #tpu.memory_space<vmem>>, vector<1x8x128xf32>
    %88 = vector.shape_cast %87 : vector<1x8x128xf32> to vector<8x128xf32>
    %c1_3 = arith.constant 1 : index
    %c0_4 = arith.constant 0 : index
    %c0_5 = arith.constant 0 : index
    %89 = vector.load %arg2[%c1_3, %c0_4, %c0_5] : memref<8x8x128xf32, #tpu.memory_space<vmem>>, vector<1x8x128xf32>
    %90 = vector.shape_cast %89 : vector<1x8x128xf32> to vector<8x128xf32>
    %c2_6 = arith.constant 2 : index
    %c0_7 = arith.constant 0 : index
    %c0_8 = arith.constant 0 : index
    %91 = vector.load %arg2[%c2_6, %c0_7, %c0_8] : memref<8x8x128xf32, #tpu.memory_space<vmem>>, vector<1x8x128xf32>
    %92 = vector.shape_cast %91 : vector<1x8x128xf32> to vector<8x128xf32>
    %c3_9 = arith.constant 3 : index
    %c0_10 = arith.constant 0 : index
    %c0_11 = arith.constant 0 : index
    %93 = vector.load %arg2[%c3_9, %c0_10, %c0_11] : memref<8x8x128xf32, #tpu.memory_space<vmem>>, vector<1x8x128xf32>
    %94 = vector.shape_cast %93 : vector<1x8x128xf32> to vector<8x128xf32>
    %c4_12 = arith.constant 4 : index
    %c0_13 = arith.constant 0 : index
    %c0_14 = arith.constant 0 : index
    %95 = vector.load %arg2[%c4_12, %c0_13, %c0_14] : memref<8x8x128xf32, #tpu.memory_space<vmem>>, vector<1x8x128xf32>
    %96 = vector.shape_cast %95 : vector<1x8x128xf32> to vector<8x128xf32>
    %c5_15 = arith.constant 5 : index
    %c0_16 = arith.constant 0 : index
    %c0_17 = arith.constant 0 : index
    %97 = vector.load %arg2[%c5_15, %c0_16, %c0_17] : memref<8x8x128xf32, #tpu.memory_space<vmem>>, vector<1x8x128xf32>
    %98 = vector.shape_cast %97 : vector<1x8x128xf32> to vector<8x128xf32>
    %c6_18 = arith.constant 6 : index
    %c0_19 = arith.constant 0 : index
    %c0_20 = arith.constant 0 : index
    %99 = vector.load %arg2[%c6_18, %c0_19, %c0_20] : memref<8x8x128xf32, #tpu.memory_space<vmem>>, vector<1x8x128xf32>
    %100 = vector.shape_cast %99 : vector<1x8x128xf32> to vector<8x128xf32>
    %c7_21 = arith.constant 7 : index
    %c0_22 = arith.constant 0 : index
    %c0_23 = arith.constant 0 : index
    %101 = vector.load %arg2[%c7_21, %c0_22, %c0_23] : memref<8x8x128xf32, #tpu.memory_space<vmem>>, vector<1x8x128xf32>
    %102 = vector.shape_cast %101 : vector<1x8x128xf32> to vector<8x128xf32>
    %103 = vector.broadcast %0 : f32 to vector<8x128xf32>
    %104 = arith.mulf %103, %88 : vector<8x128xf32>
    %105 = vector.broadcast %1 : f32 to vector<8x128xf32>
    %106 = arith.mulf %105, %90 : vector<8x128xf32>
    %107 = arith.addf %104, %106 : vector<8x128xf32>
    %108 = vector.broadcast %2 : f32 to vector<8x128xf32>
    %109 = arith.mulf %108, %92 : vector<8x128xf32>
    %110 = arith.addf %107, %109 : vector<8x128xf32>
    %111 = vector.broadcast %3 : f32 to vector<8x128xf32>
    %112 = arith.mulf %111, %94 : vector<8x128xf32>
    %113 = arith.addf %110, %112 : vector<8x128xf32>
    %114 = vector.broadcast %4 : f32 to vector<8x128xf32>
    %115 = arith.mulf %114, %96 : vector<8x128xf32>
    %116 = arith.addf %113, %115 : vector<8x128xf32>
    %117 = vector.broadcast %5 : f32 to vector<8x128xf32>
    %118 = arith.mulf %117, %98 : vector<8x128xf32>
    %119 = arith.addf %116, %118 : vector<8x128xf32>
    %120 = vector.broadcast %6 : f32 to vector<8x128xf32>
    %121 = arith.mulf %120, %100 : vector<8x128xf32>
    %122 = arith.addf %119, %121 : vector<8x128xf32>
    %123 = vector.broadcast %7 : f32 to vector<8x128xf32>
    %124 = arith.mulf %123, %102 : vector<8x128xf32>
    %125 = arith.addf %122, %124 : vector<8x128xf32>
    %126 = vector.broadcast %48 : f32 to vector<8x128xf32>
    %127 = arith.addf %125, %126 : vector<8x128xf32>
    %cst = arith.constant 5.000000e-01 : f32
    %128 = vector.broadcast %cst : f32 to vector<8x128xf32>
    %129 = arith.mulf %128, %127 : vector<8x128xf32>
    %130 = math.tanh %129 : vector<8x128xf32>
    %cst_24 = arith.constant 5.000000e-01 : f32
    %131 = vector.broadcast %cst_24 : f32 to vector<8x128xf32>
    %132 = arith.mulf %131, %130 : vector<8x128xf32>
    %cst_25 = arith.constant 5.000000e-01 : f32
    %133 = vector.broadcast %cst_25 : f32 to vector<8x128xf32>
    %134 = arith.addf %132, %133 : vector<8x128xf32>
    %135 = vector.broadcast %8 : f32 to vector<8x128xf32>
    %136 = arith.mulf %135, %88 : vector<8x128xf32>
    %137 = vector.broadcast %9 : f32 to vector<8x128xf32>
    %138 = arith.mulf %137, %90 : vector<8x128xf32>
    %139 = arith.addf %136, %138 : vector<8x128xf32>
    %140 = vector.broadcast %10 : f32 to vector<8x128xf32>
    %141 = arith.mulf %140, %92 : vector<8x128xf32>
    %142 = arith.addf %139, %141 : vector<8x128xf32>
    %143 = vector.broadcast %11 : f32 to vector<8x128xf32>
    %144 = arith.mulf %143, %94 : vector<8x128xf32>
    %145 = arith.addf %142, %144 : vector<8x128xf32>
    %146 = vector.broadcast %12 : f32 to vector<8x128xf32>
    %147 = arith.mulf %146, %96 : vector<8x128xf32>
    %148 = arith.addf %145, %147 : vector<8x128xf32>
    %149 = vector.broadcast %13 : f32 to vector<8x128xf32>
    %150 = arith.mulf %149, %98 : vector<8x128xf32>
    %151 = arith.addf %148, %150 : vector<8x128xf32>
    %152 = vector.broadcast %14 : f32 to vector<8x128xf32>
    %153 = arith.mulf %152, %100 : vector<8x128xf32>
    %154 = arith.addf %151, %153 : vector<8x128xf32>
    %155 = vector.broadcast %15 : f32 to vector<8x128xf32>
    %156 = arith.mulf %155, %102 : vector<8x128xf32>
    %157 = arith.addf %154, %156 : vector<8x128xf32>
    %158 = vector.broadcast %49 : f32 to vector<8x128xf32>
    %159 = arith.addf %157, %158 : vector<8x128xf32>
    %cst_26 = arith.constant 5.000000e-01 : f32
    %160 = vector.broadcast %cst_26 : f32 to vector<8x128xf32>
    %161 = arith.mulf %160, %159 : vector<8x128xf32>
    %162 = math.tanh %161 : vector<8x128xf32>
    %cst_27 = arith.constant 5.000000e-01 : f32
    %163 = vector.broadcast %cst_27 : f32 to vector<8x128xf32>
    %164 = arith.mulf %163, %162 : vector<8x128xf32>
    %cst_28 = arith.constant 5.000000e-01 : f32
    %165 = vector.broadcast %cst_28 : f32 to vector<8x128xf32>
    %166 = arith.addf %164, %165 : vector<8x128xf32>
    %167 = vector.broadcast %16 : f32 to vector<8x128xf32>
    %168 = arith.mulf %167, %88 : vector<8x128xf32>
    %169 = vector.broadcast %17 : f32 to vector<8x128xf32>
    %170 = arith.mulf %169, %90 : vector<8x128xf32>
    %171 = arith.addf %168, %170 : vector<8x128xf32>
    %172 = vector.broadcast %18 : f32 to vector<8x128xf32>
    %173 = arith.mulf %172, %92 : vector<8x128xf32>
    %174 = arith.addf %171, %173 : vector<8x128xf32>
    %175 = vector.broadcast %19 : f32 to vector<8x128xf32>
    %176 = arith.mulf %175, %94 : vector<8x128xf32>
    %177 = arith.addf %174, %176 : vector<8x128xf32>
    %178 = vector.broadcast %20 : f32 to vector<8x128xf32>
    %179 = arith.mulf %178, %96 : vector<8x128xf32>
    %180 = arith.addf %177, %179 : vector<8x128xf32>
    %181 = vector.broadcast %21 : f32 to vector<8x128xf32>
    %182 = arith.mulf %181, %98 : vector<8x128xf32>
    %183 = arith.addf %180, %182 : vector<8x128xf32>
    %184 = vector.broadcast %22 : f32 to vector<8x128xf32>
    %185 = arith.mulf %184, %100 : vector<8x128xf32>
    %186 = arith.addf %183, %185 : vector<8x128xf32>
    %187 = vector.broadcast %23 : f32 to vector<8x128xf32>
    %188 = arith.mulf %187, %102 : vector<8x128xf32>
    %189 = arith.addf %186, %188 : vector<8x128xf32>
    %190 = vector.broadcast %50 : f32 to vector<8x128xf32>
    %191 = arith.addf %189, %190 : vector<8x128xf32>
    %cst_29 = arith.constant 5.000000e-01 : f32
    %192 = vector.broadcast %cst_29 : f32 to vector<8x128xf32>
    %193 = arith.mulf %192, %191 : vector<8x128xf32>
    %194 = math.tanh %193 : vector<8x128xf32>
    %cst_30 = arith.constant 5.000000e-01 : f32
    %195 = vector.broadcast %cst_30 : f32 to vector<8x128xf32>
    %196 = arith.mulf %195, %194 : vector<8x128xf32>
    %cst_31 = arith.constant 5.000000e-01 : f32
    %197 = vector.broadcast %cst_31 : f32 to vector<8x128xf32>
    %198 = arith.addf %196, %197 : vector<8x128xf32>
    %199 = vector.broadcast %24 : f32 to vector<8x128xf32>
    %200 = arith.mulf %199, %88 : vector<8x128xf32>
    %201 = vector.broadcast %25 : f32 to vector<8x128xf32>
    %202 = arith.mulf %201, %90 : vector<8x128xf32>
    %203 = arith.addf %200, %202 : vector<8x128xf32>
    %204 = vector.broadcast %26 : f32 to vector<8x128xf32>
    %205 = arith.mulf %204, %92 : vector<8x128xf32>
    %206 = arith.addf %203, %205 : vector<8x128xf32>
    %207 = vector.broadcast %27 : f32 to vector<8x128xf32>
    %208 = arith.mulf %207, %94 : vector<8x128xf32>
    %209 = arith.addf %206, %208 : vector<8x128xf32>
    %210 = vector.broadcast %28 : f32 to vector<8x128xf32>
    %211 = arith.mulf %210, %96 : vector<8x128xf32>
    %212 = arith.addf %209, %211 : vector<8x128xf32>
    %213 = vector.broadcast %29 : f32 to vector<8x128xf32>
    %214 = arith.mulf %213, %98 : vector<8x128xf32>
    %215 = arith.addf %212, %214 : vector<8x128xf32>
    %216 = vector.broadcast %30 : f32 to vector<8x128xf32>
    %217 = arith.mulf %216, %100 : vector<8x128xf32>
    %218 = arith.addf %215, %217 : vector<8x128xf32>
    %219 = vector.broadcast %31 : f32 to vector<8x128xf32>
    %220 = arith.mulf %219, %102 : vector<8x128xf32>
    %221 = arith.addf %218, %220 : vector<8x128xf32>
    %222 = vector.broadcast %51 : f32 to vector<8x128xf32>
    %223 = arith.addf %221, %222 : vector<8x128xf32>
    %cst_32 = arith.constant 5.000000e-01 : f32
    %224 = vector.broadcast %cst_32 : f32 to vector<8x128xf32>
    %225 = arith.mulf %224, %223 : vector<8x128xf32>
    %226 = math.tanh %225 : vector<8x128xf32>
    %cst_33 = arith.constant 5.000000e-01 : f32
    %227 = vector.broadcast %cst_33 : f32 to vector<8x128xf32>
    %228 = arith.mulf %227, %226 : vector<8x128xf32>
    %cst_34 = arith.constant 5.000000e-01 : f32
    %229 = vector.broadcast %cst_34 : f32 to vector<8x128xf32>
    %230 = arith.addf %228, %229 : vector<8x128xf32>
    %231 = vector.broadcast %32 : f32 to vector<8x128xf32>
    %232 = arith.mulf %231, %88 : vector<8x128xf32>
    %233 = vector.broadcast %33 : f32 to vector<8x128xf32>
    %234 = arith.mulf %233, %90 : vector<8x128xf32>
    %235 = arith.addf %232, %234 : vector<8x128xf32>
    %236 = vector.broadcast %34 : f32 to vector<8x128xf32>
    %237 = arith.mulf %236, %92 : vector<8x128xf32>
    %238 = arith.addf %235, %237 : vector<8x128xf32>
    %239 = vector.broadcast %35 : f32 to vector<8x128xf32>
    %240 = arith.mulf %239, %94 : vector<8x128xf32>
    %241 = arith.addf %238, %240 : vector<8x128xf32>
    %242 = vector.broadcast %36 : f32 to vector<8x128xf32>
    %243 = arith.mulf %242, %96 : vector<8x128xf32>
    %244 = arith.addf %241, %243 : vector<8x128xf32>
    %245 = vector.broadcast %37 : f32 to vector<8x128xf32>
    %246 = arith.mulf %245, %98 : vector<8x128xf32>
    %247 = arith.addf %244, %246 : vector<8x128xf32>
    %248 = vector.broadcast %38 : f32 to vector<8x128xf32>
    %249 = arith.mulf %248, %100 : vector<8x128xf32>
    %250 = arith.addf %247, %249 : vector<8x128xf32>
    %251 = vector.broadcast %39 : f32 to vector<8x128xf32>
    %252 = arith.mulf %251, %102 : vector<8x128xf32>
    %253 = arith.addf %250, %252 : vector<8x128xf32>
    %254 = vector.broadcast %52 : f32 to vector<8x128xf32>
    %255 = arith.addf %253, %254 : vector<8x128xf32>
    %cst_35 = arith.constant 5.000000e-01 : f32
    %256 = vector.broadcast %cst_35 : f32 to vector<8x128xf32>
    %257 = arith.mulf %256, %255 : vector<8x128xf32>
    %258 = math.tanh %257 : vector<8x128xf32>
    %cst_36 = arith.constant 5.000000e-01 : f32
    %259 = vector.broadcast %cst_36 : f32 to vector<8x128xf32>
    %260 = arith.mulf %259, %258 : vector<8x128xf32>
    %cst_37 = arith.constant 5.000000e-01 : f32
    %261 = vector.broadcast %cst_37 : f32 to vector<8x128xf32>
    %262 = arith.addf %260, %261 : vector<8x128xf32>
    %263 = vector.broadcast %40 : f32 to vector<8x128xf32>
    %264 = arith.mulf %263, %88 : vector<8x128xf32>
    %265 = vector.broadcast %41 : f32 to vector<8x128xf32>
    %266 = arith.mulf %265, %90 : vector<8x128xf32>
    %267 = arith.addf %264, %266 : vector<8x128xf32>
    %268 = vector.broadcast %42 : f32 to vector<8x128xf32>
    %269 = arith.mulf %268, %92 : vector<8x128xf32>
    %270 = arith.addf %267, %269 : vector<8x128xf32>
    %271 = vector.broadcast %43 : f32 to vector<8x128xf32>
    %272 = arith.mulf %271, %94 : vector<8x128xf32>
    %273 = arith.addf %270, %272 : vector<8x128xf32>
    %274 = vector.broadcast %44 : f32 to vector<8x128xf32>
    %275 = arith.mulf %274, %96 : vector<8x128xf32>
    %276 = arith.addf %273, %275 : vector<8x128xf32>
    %277 = vector.broadcast %45 : f32 to vector<8x128xf32>
    %278 = arith.mulf %277, %98 : vector<8x128xf32>
    %279 = arith.addf %276, %278 : vector<8x128xf32>
    %280 = vector.broadcast %46 : f32 to vector<8x128xf32>
    %281 = arith.mulf %280, %100 : vector<8x128xf32>
    %282 = arith.addf %279, %281 : vector<8x128xf32>
    %283 = vector.broadcast %47 : f32 to vector<8x128xf32>
    %284 = arith.mulf %283, %102 : vector<8x128xf32>
    %285 = arith.addf %282, %284 : vector<8x128xf32>
    %286 = vector.broadcast %53 : f32 to vector<8x128xf32>
    %287 = arith.addf %285, %286 : vector<8x128xf32>
    %cst_38 = arith.constant 5.000000e-01 : f32
    %288 = vector.broadcast %cst_38 : f32 to vector<8x128xf32>
    %289 = arith.mulf %288, %287 : vector<8x128xf32>
    %290 = math.tanh %289 : vector<8x128xf32>
    %cst_39 = arith.constant 5.000000e-01 : f32
    %291 = vector.broadcast %cst_39 : f32 to vector<8x128xf32>
    %292 = arith.mulf %291, %290 : vector<8x128xf32>
    %cst_40 = arith.constant 5.000000e-01 : f32
    %293 = vector.broadcast %cst_40 : f32 to vector<8x128xf32>
    %294 = arith.addf %292, %293 : vector<8x128xf32>
    %295 = vector.broadcast %54 : f32 to vector<8x128xf32>
    %296 = arith.mulf %295, %134 : vector<8x128xf32>
    %297 = vector.broadcast %55 : f32 to vector<8x128xf32>
    %298 = arith.mulf %297, %166 : vector<8x128xf32>
    %299 = arith.addf %296, %298 : vector<8x128xf32>
    %300 = vector.broadcast %56 : f32 to vector<8x128xf32>
    %301 = arith.mulf %300, %198 : vector<8x128xf32>
    %302 = arith.addf %299, %301 : vector<8x128xf32>
    %303 = vector.broadcast %57 : f32 to vector<8x128xf32>
    %304 = arith.mulf %303, %230 : vector<8x128xf32>
    %305 = arith.addf %302, %304 : vector<8x128xf32>
    %306 = vector.broadcast %58 : f32 to vector<8x128xf32>
    %307 = arith.mulf %306, %262 : vector<8x128xf32>
    %308 = arith.addf %305, %307 : vector<8x128xf32>
    %309 = vector.broadcast %59 : f32 to vector<8x128xf32>
    %310 = arith.mulf %309, %294 : vector<8x128xf32>
    %311 = arith.addf %308, %310 : vector<8x128xf32>
    %312 = vector.broadcast %78 : f32 to vector<8x128xf32>
    %313 = arith.addf %311, %312 : vector<8x128xf32>
    %cst_41 = arith.constant 5.000000e-01 : f32
    %314 = vector.broadcast %cst_41 : f32 to vector<8x128xf32>
    %315 = arith.mulf %314, %313 : vector<8x128xf32>
    %316 = math.tanh %315 : vector<8x128xf32>
    %cst_42 = arith.constant 5.000000e-01 : f32
    %317 = vector.broadcast %cst_42 : f32 to vector<8x128xf32>
    %318 = arith.mulf %317, %316 : vector<8x128xf32>
    %cst_43 = arith.constant 5.000000e-01 : f32
    %319 = vector.broadcast %cst_43 : f32 to vector<8x128xf32>
    %320 = arith.addf %318, %319 : vector<8x128xf32>
    %321 = vector.broadcast %60 : f32 to vector<8x128xf32>
    %322 = arith.mulf %321, %134 : vector<8x128xf32>
    %323 = vector.broadcast %61 : f32 to vector<8x128xf32>
    %324 = arith.mulf %323, %166 : vector<8x128xf32>
    %325 = arith.addf %322, %324 : vector<8x128xf32>
    %326 = vector.broadcast %62 : f32 to vector<8x128xf32>
    %327 = arith.mulf %326, %198 : vector<8x128xf32>
    %328 = arith.addf %325, %327 : vector<8x128xf32>
    %329 = vector.broadcast %63 : f32 to vector<8x128xf32>
    %330 = arith.mulf %329, %230 : vector<8x128xf32>
    %331 = arith.addf %328, %330 : vector<8x128xf32>
    %332 = vector.broadcast %64 : f32 to vector<8x128xf32>
    %333 = arith.mulf %332, %262 : vector<8x128xf32>
    %334 = arith.addf %331, %333 : vector<8x128xf32>
    %335 = vector.broadcast %65 : f32 to vector<8x128xf32>
    %336 = arith.mulf %335, %294 : vector<8x128xf32>
    %337 = arith.addf %334, %336 : vector<8x128xf32>
    %338 = vector.broadcast %79 : f32 to vector<8x128xf32>
    %339 = arith.addf %337, %338 : vector<8x128xf32>
    %cst_44 = arith.constant 5.000000e-01 : f32
    %340 = vector.broadcast %cst_44 : f32 to vector<8x128xf32>
    %341 = arith.mulf %340, %339 : vector<8x128xf32>
    %342 = math.tanh %341 : vector<8x128xf32>
    %cst_45 = arith.constant 5.000000e-01 : f32
    %343 = vector.broadcast %cst_45 : f32 to vector<8x128xf32>
    %344 = arith.mulf %343, %342 : vector<8x128xf32>
    %cst_46 = arith.constant 5.000000e-01 : f32
    %345 = vector.broadcast %cst_46 : f32 to vector<8x128xf32>
    %346 = arith.addf %344, %345 : vector<8x128xf32>
    %347 = vector.broadcast %66 : f32 to vector<8x128xf32>
    %348 = arith.mulf %347, %134 : vector<8x128xf32>
    %349 = vector.broadcast %67 : f32 to vector<8x128xf32>
    %350 = arith.mulf %349, %166 : vector<8x128xf32>
    %351 = arith.addf %348, %350 : vector<8x128xf32>
    %352 = vector.broadcast %68 : f32 to vector<8x128xf32>
    %353 = arith.mulf %352, %198 : vector<8x128xf32>
    %354 = arith.addf %351, %353 : vector<8x128xf32>
    %355 = vector.broadcast %69 : f32 to vector<8x128xf32>
    %356 = arith.mulf %355, %230 : vector<8x128xf32>
    %357 = arith.addf %354, %356 : vector<8x128xf32>
    %358 = vector.broadcast %70 : f32 to vector<8x128xf32>
    %359 = arith.mulf %358, %262 : vector<8x128xf32>
    %360 = arith.addf %357, %359 : vector<8x128xf32>
    %361 = vector.broadcast %71 : f32 to vector<8x128xf32>
    %362 = arith.mulf %361, %294 : vector<8x128xf32>
    %363 = arith.addf %360, %362 : vector<8x128xf32>
    %364 = vector.broadcast %80 : f32 to vector<8x128xf32>
    %365 = arith.addf %363, %364 : vector<8x128xf32>
    %cst_47 = arith.constant 5.000000e-01 : f32
    %366 = vector.broadcast %cst_47 : f32 to vector<8x128xf32>
    %367 = arith.mulf %366, %365 : vector<8x128xf32>
    %368 = math.tanh %367 : vector<8x128xf32>
    %cst_48 = arith.constant 5.000000e-01 : f32
    %369 = vector.broadcast %cst_48 : f32 to vector<8x128xf32>
    %370 = arith.mulf %369, %368 : vector<8x128xf32>
    %cst_49 = arith.constant 5.000000e-01 : f32
    %371 = vector.broadcast %cst_49 : f32 to vector<8x128xf32>
    %372 = arith.addf %370, %371 : vector<8x128xf32>
    %373 = vector.broadcast %72 : f32 to vector<8x128xf32>
    %374 = arith.mulf %373, %134 : vector<8x128xf32>
    %375 = vector.broadcast %73 : f32 to vector<8x128xf32>
    %376 = arith.mulf %375, %166 : vector<8x128xf32>
    %377 = arith.addf %374, %376 : vector<8x128xf32>
    %378 = vector.broadcast %74 : f32 to vector<8x128xf32>
    %379 = arith.mulf %378, %198 : vector<8x128xf32>
    %380 = arith.addf %377, %379 : vector<8x128xf32>
    %381 = vector.broadcast %75 : f32 to vector<8x128xf32>
    %382 = arith.mulf %381, %230 : vector<8x128xf32>
    %383 = arith.addf %380, %382 : vector<8x128xf32>
    %384 = vector.broadcast %76 : f32 to vector<8x128xf32>
    %385 = arith.mulf %384, %262 : vector<8x128xf32>
    %386 = arith.addf %383, %385 : vector<8x128xf32>
    %387 = vector.broadcast %77 : f32 to vector<8x128xf32>
    %388 = arith.mulf %387, %294 : vector<8x128xf32>
    %389 = arith.addf %386, %388 : vector<8x128xf32>
    %390 = vector.broadcast %81 : f32 to vector<8x128xf32>
    %391 = arith.addf %389, %390 : vector<8x128xf32>
    %cst_50 = arith.constant 5.000000e-01 : f32
    %392 = vector.broadcast %cst_50 : f32 to vector<8x128xf32>
    %393 = arith.mulf %392, %391 : vector<8x128xf32>
    %394 = math.tanh %393 : vector<8x128xf32>
    %cst_51 = arith.constant 5.000000e-01 : f32
    %395 = vector.broadcast %cst_51 : f32 to vector<8x128xf32>
    %396 = arith.mulf %395, %394 : vector<8x128xf32>
    %cst_52 = arith.constant 5.000000e-01 : f32
    %397 = vector.broadcast %cst_52 : f32 to vector<8x128xf32>
    %398 = arith.addf %396, %397 : vector<8x128xf32>
    %399 = vector.broadcast %82 : f32 to vector<8x128xf32>
    %400 = arith.mulf %399, %320 : vector<8x128xf32>
    %401 = vector.broadcast %83 : f32 to vector<8x128xf32>
    %402 = arith.mulf %401, %346 : vector<8x128xf32>
    %403 = arith.addf %400, %402 : vector<8x128xf32>
    %404 = vector.broadcast %84 : f32 to vector<8x128xf32>
    %405 = arith.mulf %404, %372 : vector<8x128xf32>
    %406 = arith.addf %403, %405 : vector<8x128xf32>
    %407 = vector.broadcast %85 : f32 to vector<8x128xf32>
    %408 = arith.mulf %407, %398 : vector<8x128xf32>
    %409 = arith.addf %406, %408 : vector<8x128xf32>
    %410 = vector.broadcast %86 : f32 to vector<8x128xf32>
    %411 = arith.addf %409, %410 : vector<8x128xf32>
    %cst_53 = arith.constant 5.000000e-01 : f32
    %412 = vector.broadcast %cst_53 : f32 to vector<8x128xf32>
    %413 = arith.mulf %412, %411 : vector<8x128xf32>
    %414 = math.tanh %413 : vector<8x128xf32>
    %cst_54 = arith.constant 5.000000e-01 : f32
    %415 = vector.broadcast %cst_54 : f32 to vector<8x128xf32>
    %416 = arith.mulf %415, %414 : vector<8x128xf32>
    %cst_55 = arith.constant 5.000000e-01 : f32
    %417 = vector.broadcast %cst_55 : f32 to vector<8x128xf32>
    %418 = arith.addf %416, %417 : vector<8x128xf32>
    %c0_56 = arith.constant 0 : index
    %c0_57 = arith.constant 0 : index
    %419 = vector.load %arg3[%c0_56, %c0_57] : memref<8x128xf32, #tpu.memory_space<vmem>>, vector<8x128xf32>
    tpu.vector_store %arg3[%c0_56, %c0_57], %418 {strides = array<i32>} : memref<8x128xf32, #tpu.memory_space<vmem>>, vector<8x128xf32>,
    return
  }
  func.func @transform_0(%arg0: i32) -> i32 {
    %c0_i32 = arith.constant 0 : i32
    %c0_i32_0 = arith.constant 0 : i32
    return %c0_i32 : i32
  }
  func.func @transform_1(%arg0: i32) -> (i32, i32, i32) {
    %c0_i32 = arith.constant 0 : i32
    %c0_i32_0 = arith.constant 0 : i32
    %c0_i32_1 = arith.constant 0 : i32
    return %c0_i32, %arg0, %c0_i32_0 : i32, i32, i32
  }
  func.func @transform_2(%arg0: i32) -> (i32, i32) {
    %c0_i32 = arith.constant 0 : i32
    %c0_i32_0 = arith.constant 0 : i32
    return %arg0, %c0_i32 : i32, i32
  }
}

</mosaic_0001>

<bundles_post_ra>
// kernel: tpu_custom_call.1
= control target key start
LH: loop header
LB: loop body
LE: loop exit
PB: predicated region body
PF: predicated region fallthrough
CT: control target
= control target key end

     0   :  { %7 = vsyncpa [#allocation5], 0  ;;  %s966_s0 = inlined_call_operand.hbm [shape: f32[87], index: 0, kind: input, shape index: {}]   ;;  %s967_s1 = inlined_call_operand.hbm [shape: f32[8,8,128], index: 1, kind: input, shape index: {}]   ;;  %s968_s2 = inlined_call_operand.hbm [shape: f32[8,128], index: 2, kind: output, shape index: {}]  }
   0x1   :  { %8 = vsyncpa [#allocation3], 0 }
   0x2   :  { %9 = vsyncpa [#allocation4], 0  ;;  %s15_s11 = sshll.u32 %s966_s0, 4  ;;  %s23_s14 = sshll.u32 %s967_s1, 4  ;;  %s16_s11 = int_to_ptr.hbm [resolvable:$true] %s15_s11  ;;  %s24_s14 = int_to_ptr.hbm [resolvable:$true] %s23_s14 }
   0x3   :  { %s624_s15 = smov [#allocation2]   ;;  %s625_s16 = smov [#allocation6]  }
   0x4   :  { %18 = dma.hbm_to_smem %s16_s11, 16, %s624_s15, [#allocation5]  }
   0x5   :  { %s25_s17 = sshll.u32 %s625_s16, 4  ;;  %s626_s18 = smov 128   ;;  %s26_s17 = int_to_ptr.vmem [resolvable:$true] %s25_s17 }
   0x6   :  { %s627_s19 = smov 8  }
   0x7   :  { %31 = dma.hbm_to_vmem [thread:$0]  %s24_s14, 1024, %s26_s17, [#allocation3], %s626_s18, %s626_s18, %s627_s19  }
   0x8   :  { %618 = dma.done.wait [#allocation5], 16  }
   0x9   :  { %619 = vsyncadd [#allocation5], 4294967280 }
   0xa   :  { %620 = dma.done.wait [#allocation3], 1024  }
   0xb   :  { %621 = vsyncadd [#allocation3], 4294966272 }
   0xc   :  { %40 = sfence }
   0xd   :  { %s41_s0 = sld [smem:[#allocation2]]  ;;  %v666_v0 = vld [vmem:[#allocation6] sm:$0xff]  ;;  %v668_v1 = vld [vmem:[#allocation6 + $0x8] sm:$0xff]  ;;  %v676_v6 = vld [vmem:[#allocation6 + $0x10] sm:$0xff] }
   0xe   :  { %s445_s20 = sld [smem:[#allocation2 + $0x1]]  ;;  %v683_v12 = vld [vmem:[#allocation6 + $0x18] sm:$0xff]  ;;  %v699_v20 = vld [vmem:[#allocation6 + $0x20] sm:$0xff]  ;;  %v715_v31 = vld [vmem:[#allocation6 + $0x28] sm:$0xff] }
   0xf   :  { %s446_s21 = sld [smem:[#allocation2 + $0x2]]  ;;  %v733_v43 = vld [vmem:[#allocation6 + $0x30] sm:$0xff] }
  0x10   :  { %s650_s22 = sld [smem:[#allocation2 + $0x3]] }
  0x11   :  { %s652_s1 = sld [smem:[#allocation2 + $0x4]] }
  0x12   :  { %s654_s23 = sld [smem:[#allocation2 + $0x5]] }
  0x13   :  { %s656_s24 = sld [smem:[#allocation2 + $0x6]]  ;;  %v143_v2 = vstv %s41_s0 }
  0x14   :  { %s658_s25 = sld [smem:[#allocation2 + $0x7]]  ;;  %v145_v3 = vstv %s445_s20  ;;  %v144_v4 = vmul.f32 %v143_v2, %v666_v0 }
  0x15   :  { %s452_s26 = sld [smem:[#allocation2 + $0x8]]  ;;  %v146_v5 = vmul.f32 %v145_v3, %v668_v1  ;;  %v148_v7 = vstv %s446_s21 }
  0x16   :  { %s453_s27 = sld [smem:[#allocation2 + $0x9]]  ;;  %v149_v11 = vmul.f32 %v148_v7, %v676_v6  ;;  %v151_v13 = vstv %s650_s22 }
  0x17   :  { %s660_s28 = sld [smem:[#allocation2 + $0xa]]  ;;  %v147_v10 = vadd.f32 %v146_v5, %v144_v4  ;;  %v152_v18 = vmul.f32 %v151_v13, %v683_v12  ;;  %v154_v21 = vstv %s652_s1 }
  0x18   :  { %s662_s29 = sld [smem:[#allocation2 + $0xb]]  ;;  %v155_v28 = vmul.f32 %v154_v21, %v699_v20  ;;  %v157_v32 = vstv %s654_s23 }
  0x19   :  { %s664_s30 = sld [smem:[#allocation2 + $0xc]]  ;;  %v150_v17 = vadd.f32 %v149_v11, %v147_v10  ;;  %v158_v41 = vmul.f32 %v157_v32, %v715_v31  ;;  %v160_v44 = vstv %s656_s24 }
  0x1a   :  { %s670_s3 = sld [smem:[#allocation2 + $0xd]]  ;;  %v161_v57 = vmul.f32 %v160_v44, %v733_v43 }
  0x1b   :  { %s674_s4 = sld [smem:[#allocation2 + $0xe]]  ;;  %v172_v8 = vstv %s452_s26  ;;  %v153_v27 = vadd.f32 %v152_v18, %v150_v17 }
  0x1c   :  { %s678_s5 = sld [smem:[#allocation2 + $0xf]]  ;;  %v174_v9 = vstv %s453_s27  ;;  %v173_v14 = vmul.f32 %v172_v8, %v666_v0 }
  0x1d   :  { %s460_s6 = sld [smem:[#allocation2 + $0x10]]  ;;  %v175_v15 = vmul.f32 %v174_v9, %v668_v1  ;;  %v177_v16 = vstv %s660_s28  ;;  %v156_v40 = vadd.f32 %v155_v28, %v153_v27  ;;  %v163_v9 = vstv %s658_s25 }
  0x1e   :  { %s461_s7 = sld [smem:[#allocation2 + $0x11]]  ;;  %v178_v19 = vmul.f32 %v177_v16, %v676_v6  ;;  %v180_v23 = vstv %s662_s29 }
  0x1f   :  { %s681_s8 = sld [smem:[#allocation2 + $0x12]]  ;;  %v176_v22 = vadd.f32 %v175_v15, %v173_v14  ;;  %v181_v29 = vmul.f32 %v180_v23, %v683_v12  ;;  %v183_v34 = vstv %s664_s30  ;;  %v159_v56 = vadd.f32 %v158_v41, %v156_v40 }
  0x20   :  { %s689_s9 = sld [smem:[#allocation2 + $0x13]]  ;;  %v186_v36 = vstv %s670_s3  ;;  %v184_v42 = vmul.f32 %v183_v34, %v699_v20 }
  0x21   :  { %s691_s10 = sld [smem:[#allocation2 + $0x14]]  ;;  %v179_v33 = vadd.f32 %v178_v19, %v176_v22  ;;  %v187_v46 = vmul.f32 %v186_v36, %v715_v31  ;;  %v189_v52 = vstv %s674_s4  ;;  %v767_v8 = vadd.f32 %v161_v57, %v159_v56  ;;  %v783_v22 = vld [vmem:[#allocation6 + $0x38] sm:$0xff] }
  0x22   :  { %s693_s11 = sld [smem:[#allocation2 + $0x15]]  ;;  %v190_v4 = vmul.f32 %v189_v52, %v733_v43  ;;  %v192_v10 = vstv %s678_s5  ;;  %v164_v36 = vmul.f32 %v163_v9, %v783_v22 }
  0x23   :  { %s697_s12 = sld [smem:[#allocation2 + $0x16]]  ;;  %v201_v24 = vstv %s460_s6  ;;  %v182_v45 = vadd.f32 %v181_v29, %v179_v33  ;;  %v193_v40 = vmul.f32 %v192_v10, %v783_v22 }
  0x24   :  { %s703_s13 = sld [smem:[#allocation2 + $0x17]]  ;;  %v202_v25 = vmul.f32 %v201_v24, %v666_v0  ;;  %v203_v26 = vstv %s461_s7 }
  0x25   :  { %s706_s14 = sld [smem:[#allocation2 + $0x18]]  ;;  %v204_v30 = vmul.f32 %v203_v26, %v668_v1  ;;  %v206_v35 = vstv %s681_s8  ;;  %v185_v60 = vadd.f32 %v184_v42, %v182_v45 }
  0x26   :  { %s708_s15 = sld [smem:[#allocation2 + $0x19]]  ;;  %v207_v38 = vmul.f32 %v206_v35, %v676_v6  ;;  %v209_v39 = vstv %s689_s9 }
  0x27   :  { %s713_s16 = sld [smem:[#allocation2 + $0x1a]]  ;;  %v205_v37 = vadd.f32 %v204_v30, %v202_v25  ;;  %v210_v49 = vmul.f32 %v209_v39, %v683_v12  ;;  %v212_v53 = vstv %s691_s10  ;;  %v188_v13 = vadd.f32 %v187_v46, %v185_v60 }
  0x28   :  { %s720_s17 = sld [smem:[#allocation2 + $0x1b]]  ;;  %v213_v3 = vmul.f32 %v212_v53, %v699_v20  ;;  %v215_v5 = vstv %s693_s11 }
  0x29   :  { %s724_s18 = sld [smem:[#allocation2 + $0x1c]]  ;;  %v208_v48 = vadd.f32 %v207_v38, %v205_v37  ;;  %v216_v18 = vmul.f32 %v215_v5, %v715_v31  ;;  %v218_v23 = vstv %s697_s12  ;;  %v191_v45 = vadd.f32 %v190_v4, %v188_v13 }
  0x2a   :  { %s727_s19 = sld [smem:[#allocation2 + $0x1d]]  ;;  %v221_v24 = vstv %s703_s13  ;;  %v219_v38 = vmul.f32 %v218_v23, %v733_v43 }
  0x2b   :  { %s731_s0 = sld [smem:[#allocation2 + $0x1e]]  ;;  %v230_v47 = vstv %s706_s14  ;;  %v211_v2 = vadd.f32 %v210_v49, %v208_v48  ;;  %v222_v46 = vmul.f32 %v221_v24, %v783_v22 }
  0x2c   :  { %s738_s20 = sld [smem:[#allocation2 + $0x1f]]  ;;  %v231_v50 = vmul.f32 %v230_v47, %v666_v0  ;;  %v232_v51 = vstv %s708_s15 }
  0x2d   :  { %s743_s21 = sld [smem:[#allocation2 + $0x20]]  ;;  %v233_v54 = vmul.f32 %v232_v51, %v668_v1  ;;  %v235_v55 = vstv %s713_s16  ;;  %v214_v17 = vadd.f32 %v213_v3, %v211_v2 }
  0x2e   :  { %s749_s22 = sld [smem:[#allocation2 + $0x21]]  ;;  %v236_v58 = vmul.f32 %v235_v55, %v676_v6  ;;  %v238_v59 = vstv %s720_s17 }
  0x2f   :  { %s754_s1 = sld [smem:[#allocation2 + $0x22]]  ;;  %v234_v61 = vadd.f32 %v233_v54, %v231_v50  ;;  %v239_v62 = vmul.f32 %v238_v59, %v683_v12  ;;  %v241_v63 = vstv %s724_s18  ;;  %v217_v37 = vadd.f32 %v216_v18, %v214_v17 }
  0x30   :  { %s758_s23 = sld [smem:[#allocation2 + $0x23]]  ;;  %v242_v11 = vmul.f32 %v241_v63, %v699_v20  ;;  %v244_v15 = vstv %s727_s19 }
  0x31   :  { %s761_s24 = sld [smem:[#allocation2 + $0x24]]  ;;  %v237_v7 = vadd.f32 %v236_v58, %v234_v61  ;;  %v245_v28 = vmul.f32 %v244_v15, %v715_v31  ;;  %v247_v32 = vstv %s731_s0  ;;  %v220_v53 = vadd.f32 %v219_v38, %v217_v37 }
  0x32   :  { %s765_s26 = sld [smem:[#allocation2 + $0x25]]  ;;  %v248_v48 = vmul.f32 %v247_v32, %v733_v43  ;;  %v250_v49 = vstv %s738_s20 }
  0x33   :  { %s772_s27 = sld [smem:[#allocation2 + $0x26]]  ;;  %v240_v14 = vadd.f32 %v239_v62, %v237_v7  ;;  %v259_v16 = vstv %s743_s21  ;;  %v251_v62 = vmul.f32 %v250_v49, %v783_v22 }
  0x34   :  { %s776_s28 = sld [smem:[#allocation2 + $0x27]]  ;;  %v260_v19 = vmul.f32 %v259_v16, %v666_v0  ;;  %v261_v21 = vstv %s749_s22 }
  0x35   :  { %s781_s25 = sld [smem:[#allocation2 + $0x28]]  ;;  %v262_v25 = vmul.f32 %v261_v21, %v668_v1  ;;  %v264_v26 = vstv %s754_s1  ;;  %v243_v27 = vadd.f32 %v242_v11, %v240_v14 }
  0x36   :  { %s789_s29 = sld [smem:[#allocation2 + $0x29]]  ;;  %v265_v29 = vmul.f32 %v264_v26, %v676_v6  ;;  %v267_v30 = vstv %s758_s23 }
  0x37   :  { %s794_s30 = sld [smem:[#allocation2 + $0x2a]]  ;;  %v263_v33 = vadd.f32 %v262_v25, %v260_v19  ;;  %v268_v34 = vmul.f32 %v267_v30, %v683_v12  ;;  %v270_v35 = vstv %s761_s24  ;;  %v246_v47 = vadd.f32 %v245_v28, %v243_v27 }
  0x38   :  { %s799_s3 = sld [smem:[#allocation2 + $0x2b]]  ;;  %v273_v39 = vstv %s765_s26  ;;  %v271_v42 = vmul.f32 %v270_v35, %v699_v20 }
  0x39   :  { %s804_s4 = sld [smem:[#allocation2 + $0x2c]]  ;;  %v266_v41 = vadd.f32 %v265_v29, %v263_v33  ;;  %v276_v44 = vstv %s772_s27  ;;  %v274_v51 = vmul.f32 %v273_v39, %v715_v31  ;;  %v249_v61 = vadd.f32 %v248_v48, %v246_v47 }
  0x3a   :  { %s809_s5 = sld [smem:[#allocation2 + $0x2d]]  ;;  %v277_v54 = vmul.f32 %v276_v44, %v733_v43  ;;  %v279_v58 = vstv %s776_s28 }
  0x3b   :  { %s813_s6 = sld [smem:[#allocation2 + $0x2e]]  ;;  %v269_v50 = vadd.f32 %v268_v34, %v266_v41  ;;  %v288_v52 = vstv %s781_s25  ;;  %v280_v7 = vmul.f32 %v279_v58, %v783_v22  ;;  %v252_v14 = vadd.f32 %v251_v62, %v249_v61 }
  0x3c   :  { %s818_s7 = sld [smem:[#allocation2 + $0x2f]]  ;;  %v289_v55 = vmul.f32 %v288_v52, %v666_v0  ;;  %v290_v56 = vstv %s789_s29 }
  0x3d   :  { %s823_s8 = sld [smem:[#allocation2 + $0x30]]  ;;  %v272_v57 = vadd.f32 %v271_v42, %v269_v50  ;;  %v291_v59 = vmul.f32 %v290_v56, %v668_v1  ;;  %v293_v60 = vstv %s794_s30  ;;  %v165_v1 = vadd.f32 %v164_v36, %v767_v8 }
  0x3e   :  { %s828_s9 = sld [smem:[#allocation2 + $0x31]]  ;;  %v294_v63 = vmul.f32 %v293_v60, %v676_v6  ;;  %v296_v2 = vstv %s799_s3  ;;  %v194_v6 = vadd.f32 %v193_v40, %v191_v45 }
  0x3f   :  { %s833_s10 = sld [smem:[#allocation2 + $0x32]]  ;;  %v275_v0 = vadd.f32 %v274_v51, %v272_v57  ;;  %v292_v3 = vadd.f32 %v291_v59, %v289_v55  ;;  %v297_v4 = vmul.f32 %v296_v2, %v683_v12  ;;  %v299_v5 = vstv %s804_s4 }
  0x40   :  { %s837_s11 = sld [smem:[#allocation2 + $0x33]]  ;;  %v302_v9 = vstv %s809_s5  ;;  %v300_v13 = vmul.f32 %v299_v5, %v699_v20  ;;  %v223_v12 = vadd.f32 %v222_v46, %v220_v53 }
  0x41   :  { %s842_s12 = sld [smem:[#allocation2 + $0x34]]  ;;  %v278_v10 = vadd.f32 %v277_v54, %v275_v0  ;;  %v295_v11 = vadd.f32 %v294_v63, %v292_v3  ;;  %v305_v15 = vstv %s813_s6  ;;  %v303_v17 = vmul.f32 %v302_v9, %v715_v31 }
  0x42   :  { %s845_s13 = sld [smem:[#allocation2 + $0x35]]  ;;  %v308_v18 = vstv %s818_s7  ;;  %v306_v26 = vmul.f32 %v305_v15, %v733_v43 }
  0x43   :  { %s848_s14 = sld [smem:[#allocation2 + $0x36]]  ;;  %v166_v8 = vstv %s823_s8  ;;  %v298_v16 = vadd.f32 %v297_v4, %v295_v11  ;;  %v281_v20 = vadd.f32 %v280_v7, %v278_v10  ;;  %v309_v31 = vmul.f32 %v308_v18, %v783_v22 }
  0x44   :  { %s853_s15 = sld [smem:[#allocation2 + $0x37]]  ;;  %v167_v19 = vadd.f32 %v166_v8, %v165_v1  ;;  %v195_v21 = vstv %s828_s9 }
  0x45   :  { %s856_s16 = sld [smem:[#allocation2 + $0x38]]  ;;  %v196_v23 = vadd.f32 %v195_v21, %v194_v6  ;;  %v224_v24 = vstv %s833_s10  ;;  %v301_v25 = vadd.f32 %v300_v13, %v298_v16 }
  0x46   :  { %s860_s17 = sld [smem:[#allocation2 + $0x39]]  ;;  %v168_v27 = vmul.f32 0.5, %v167_v19  ;;  %v225_v28 = vadd.f32 %v224_v24, %v223_v12  ;;  %v253_v29 = vstv %s837_s11 }
  0x47   :  { %s864_s18 = sld [smem:[#allocation2 + $0x3a]]  ;;  %v197_v30 = vmul.f32 0.5, %v196_v23  ;;  %v254_v32 = vadd.f32 %v253_v29, %v252_v14  ;;  %v282_v33 = vstv %s842_s12  ;;  %v304_v34 = vadd.f32 %v303_v17, %v301_v25 }
  0x48   :  { %s867_s19 = sld [smem:[#allocation2 + $0x3b]]  ;;  %536 = vtanh.f32 %v168_v27  ;;  %v226_v35 = vmul.f32 0.5, %v225_v28  ;;  %v283_v36 = vadd.f32 %v282_v33, %v281_v20  ;;  %v311_v38 = vstv %s845_s13 }
  0x49   :  { %s869_s0 = sld [smem:[#allocation2 + $0x3c]]  ;;  %538 = vtanh.f32 %v197_v30  ;;  %v255_v43 = vmul.f32 0.5, %v254_v32  ;;  %v307_v37 = vadd.f32 %v306_v26, %v304_v34  ;;  %v317_v42 = vstv %s848_s14 }
  0x4a   :  { %s871_s20 = sld [smem:[#allocation2 + $0x3d]]  ;;  %540 = vtanh.f32 %v226_v35  ;;  %v284_v22 = vmul.f32 0.5, %v283_v36  ;;  %v319_v44 = vstv %s853_s15 }
  0x4b   :  { %s874_s21 = sld [smem:[#allocation2 + $0x3e]]  ;;  %542 = vtanh.f32 %v255_v43  ;;  %v310_v39 = vadd.f32 %v309_v31, %v307_v37  ;;  %v322_v48 = vstv %s856_s16 }
  0x4c   :  { %s876_s22 = sld [smem:[#allocation2 + $0x3f]]  ;;  %544 = vtanh.f32 %v284_v22  ;;  %v325_v49 = vstv %s860_s17  ;;  %s628_s17 = smov [#allocation7]  }
  0x4d   :  { %s878_s1 = sld [smem:[#allocation2 + $0x40]]  ;;  %v312_v40 = vadd.f32 %v311_v38, %v310_v39  ;;  %v328_v52 = vstv %s864_s18  ;;  %s432_s18 = sshll.u32 %s628_s17, 4  ;;  %s433_s18 = int_to_ptr.vmem [resolvable:$true] %s432_s18 }
  0x4e   :  { %v537_v41 = vpop.eup %536  ;;  %s880_s23 = sld [smem:[#allocation2 + $0x41]]  ;;  %v331_v53 = vstv %s867_s19 }
  0x4f   :  { %v539_v45 = vpop.eup %538  ;;  %s884_s24 = sld [smem:[#allocation2 + $0x42]]  ;;  %v170_v46 = vmul.f32 0.5, %v537_v41  ;;  %v313_v47 = vmul.f32 0.5, %v312_v40  ;;  %v340_v54 = vstv %s869_s0 }
  0x50   :  { %v541_v50 = vpop.eup %540  ;;  %s888_s26 = sld [smem:[#allocation2 + $0x43]]  ;;  %v199_v51 = vmul.f32 0.5, %v539_v45  ;;  %v342_v58 = vstv %s871_s20  ;;  %s434_s20 = sshll.u32 %s968_s2, 4  ;;  %s435_s20 = int_to_ptr.hbm [resolvable:$true] %s434_s20 }
  0x51   :  { %v543_v55 = vpop.eup %542  ;;  %s893_s27 = sld [smem:[#allocation2 + $0x44]]  ;;  %v895_v56 = vadd.f32 0.5, %v170_v46  ;;  %v228_v57 = vmul.f32 0.5, %v541_v50  ;;  %546 = vtanh.f32 %v313_v47  ;;  %v345_v62 = vstv %s874_s21 }
  0x52   :  { %v545_v59 = vpop.eup %544  ;;  %s898_s28 = sld [smem:[#allocation2 + $0x45]]  ;;  %v900_v60 = vadd.f32 0.5, %v199_v51  ;;  %v257_v61 = vmul.f32 0.5, %v543_v55  ;;  %v348_v63 = vstv %s876_s22 }
  0x53   :  { %s904_s25 = sld [smem:[#allocation2 + $0x46]]  ;;  %v906_v2 = vadd.f32 0.5, %v228_v57  ;;  %v286_v0 = vmul.f32 0.5, %v545_v59  ;;  %v318_v3 = vmul.f32 %v317_v42, %v895_v56  ;;  %v341_v4 = vmul.f32 %v340_v54, %v895_v56 }
  0x54   :  { %s910_s29 = sld [smem:[#allocation2 + $0x47]]  ;;  %v258_v5 = vadd.f32 0.5, %v257_v61  ;;  %v320_v1 = vmul.f32 %v319_v44, %v900_v60  ;;  %v343_v7 = vmul.f32 %v342_v58, %v900_v60  ;;  %v351_v9 = vstv %s878_s1 }
  0x55   :  { %s915_s30 = sld [smem:[#allocation2 + $0x48]]  ;;  %v917_v6 = vadd.f32 0.5, %v286_v0  ;;  %v323_v10 = vmul.f32 %v322_v48, %v906_v2  ;;  %v346_v11 = vmul.f32 %v345_v62, %v906_v2  ;;  %v354_v13 = vstv %s880_s23 }
  0x56   :  { %s922_s3 = sld [smem:[#allocation2 + $0x49]]  ;;  %v321_v12 = vadd.f32 %v320_v1, %v318_v3  ;;  %v326_v14 = vmul.f32 %v325_v49, %v258_v5  ;;  %v344_v15 = vadd.f32 %v343_v7, %v341_v4  ;;  %v349_v8 = vmul.f32 %v348_v63, %v258_v5 }
  0x57   :  { %v547_v16 = vpop.eup %546  ;;  %s924_s4 = sld [smem:[#allocation2 + $0x4a]]  ;;  %v329_v17 = vmul.f32 %v328_v52, %v917_v6  ;;  %v352_v18 = vmul.f32 %v351_v9, %v917_v6  ;;  %v363_v19 = vstv %s884_s24  ;;  %v365_v21 = vstv %s888_s26 }
  0x58   :  { %s930_s5 = sld [smem:[#allocation2 + $0x4b]]  ;;  %v315_v20 = vmul.f32 0.5, %v547_v16  ;;  %v324_v23 = vadd.f32 %v323_v10, %v321_v12  ;;  %v347_v24 = vadd.f32 %v346_v11, %v344_v15  ;;  %v364_v25 = vmul.f32 %v363_v19, %v895_v56 }
  0x59   :  { %s933_s6 = sld [smem:[#allocation2 + $0x4c]]  ;;  %v366_v26 = vmul.f32 %v365_v21, %v900_v60  ;;  %v368_v27 = vstv %s893_s27  ;;  %v371_v28 = vstv %s898_s28  ;;  %v374_v29 = vstv %s904_s25 }
  0x5a   :  { %s939_s7 = sld [smem:[#allocation2 + $0x4d]]  ;;  %v316_v31 = vadd.f32 0.5, %v315_v20  ;;  %v327_v30 = vadd.f32 %v326_v14, %v324_v23  ;;  %v350_v32 = vadd.f32 %v349_v8, %v347_v24  ;;  %v369_v33 = vmul.f32 %v368_v27, %v906_v2 }
  0x5b   :  { %s942_s8 = sld [smem:[#allocation2 + $0x4e]]  ;;  %v367_v34 = vadd.f32 %v366_v26, %v364_v25  ;;  %v372_v35 = vmul.f32 %v371_v28, %v258_v5  ;;  %v375_v36 = vmul.f32 %v374_v29, %v917_v6  ;;  %v377_v43 = vstv %s910_s29 }
  0x5c   :  { %s523_s9 = sld [smem:[#allocation2 + $0x4f]]  ;;  %v330_v37 = vadd.f32 %v329_v17, %v327_v30  ;;  %v332_v22 = vmul.f32 %v331_v53, %v316_v31  ;;  %v353_v38 = vadd.f32 %v352_v18, %v350_v32  ;;  %v355_v39 = vmul.f32 %v354_v13, %v316_v31 }
  0x5d   :  { %s946_s10 = sld [smem:[#allocation2 + $0x50]]  ;;  %v370_v40 = vadd.f32 %v369_v33, %v367_v34  ;;  %v378_v41 = vmul.f32 %v377_v43, %v316_v31  ;;  %v386_v42 = vstv %s915_s30  ;;  %v388_v44 = vstv %s922_s3 }
  0x5e   :  { %v333_v45 = vadd.f32 %v332_v22, %v330_v37  ;;  %v356_v46 = vadd.f32 %v355_v39, %v353_v38  ;;  %v387_v47 = vmul.f32 %v386_v42, %v895_v56  ;;  %v389_v48 = vmul.f32 %v388_v44, %v900_v60  ;;  %s952_s11 = sld [smem:[#allocation2 + $0x51]] }
  0x5f   :  { %v373_v49 = vadd.f32 %v372_v35, %v370_v40  ;;  %v391_v50 = vstv %s924_s4  ;;  %v394_v51 = vstv %s930_s5  ;;  %v397_v52 = vstv %s933_s6  ;;  %s526_s12 = sld [smem:[#allocation2 + $0x52]] }
  0x60   :  { %v390_v53 = vadd.f32 %v389_v48, %v387_v47  ;;  %v392_v54 = vmul.f32 %v391_v50, %v906_v2  ;;  %v395_v55 = vmul.f32 %v394_v51, %v258_v5  ;;  %v400_v59 = vstv %s939_s7  ;;  %s527_s13 = sld [smem:[#allocation2 + $0x53]] }
  0x61   :  { %v334_v57 = vstv %s942_s8  ;;  %v376_v58 = vadd.f32 %v375_v36, %v373_v49  ;;  %v398_v56 = vmul.f32 %v397_v52, %v917_v6  ;;  %v401_v7 = vmul.f32 %v400_v59, %v316_v31  ;;  %s528_s14 = sld [smem:[#allocation2 + $0x54]] }
  0x62   :  { %v335_v61 = vadd.f32 %v334_v57, %v333_v45  ;;  %v357_v62 = vstv %s523_s9  ;;  %v393_v63 = vadd.f32 %v392_v54, %v390_v53  ;;  %s529_s15 = sld [smem:[#allocation2 + $0x55]] }
  0x63   :  { %v358_v60 = vadd.f32 %v357_v62, %v356_v46  ;;  %v379_v0 = vadd.f32 %v378_v41, %v376_v58  ;;  %v380_v3 = vstv %s946_s10  ;;  %s530_s16 = sld [smem:[#allocation2 + $0x56]] }
  0x64   :  { %v336_v4 = vmul.f32 0.5, %v335_v61  ;;  %v396_v1 = vadd.f32 %v395_v55, %v393_v63  ;;  %v403_v11 = vstv %s952_s11 }
  0x65   :  { %v359_v9 = vmul.f32 0.5, %v358_v60  ;;  %v381_v10 = vadd.f32 %v380_v3, %v379_v0  ;;  %v409_v17 = vstv %s526_s12 }
  0x66   :  { %548 = vtanh.f32 %v336_v4  ;;  %v399_v2 = vadd.f32 %v398_v56, %v396_v1  ;;  %v411_v21 = vstv %s527_s13 }
  0x67   :  { %550 = vtanh.f32 %v359_v9  ;;  %v382_v5 = vmul.f32 0.5, %v381_v10  ;;  %v414_v25 = vstv %s528_s14 }
  0x68   :  { %v402_v13 = vadd.f32 %v401_v7, %v399_v2  ;;  %v417_v32 = vstv %s529_s15 }
  0x69   :  { %552 = vtanh.f32 %v382_v5  ;;  %v420_v36 = vstv %s530_s16 }
  0x6a   :  { %v404_v12 = vadd.f32 %v403_v11, %v402_v13 }
  0x6c   :  { %v549_v6 = vpop.eup %548  ;;  %v405_v14 = vmul.f32 0.5, %v404_v12 }
  0x6d   :  { %v551_v15 = vpop.eup %550  ;;  %v338_v8 = vmul.f32 0.5, %v549_v6 }
  0x6e   :  { %v361_v16 = vmul.f32 0.5, %v551_v15  ;;  %554 = vtanh.f32 %v405_v14 }
  0x6f   :  { %v553_v18 = vpop.eup %552  ;;  %v339_v19 = vadd.f32 0.5, %v338_v8 }
  0x70   :  { %v362_v20 = vadd.f32 0.5, %v361_v16  ;;  %v384_v23 = vmul.f32 0.5, %v553_v18 }
  0x71   :  { %v410_v24 = vmul.f32 %v409_v17, %v339_v19 }
  0x72   :  { %v385_v26 = vadd.f32 0.5, %v384_v23  ;;  %v412_v27 = vmul.f32 %v411_v21, %v362_v20 }
  0x74   :  { %v555_v28 = vpop.eup %554  ;;  %v413_v29 = vadd.f32 %v412_v27, %v410_v24  ;;  %v415_v31 = vmul.f32 %v414_v25, %v385_v26 }
  0x75   :  { %v407_v30 = vmul.f32 0.5, %v555_v28 }
  0x76   :  { %v416_v34 = vadd.f32 %v415_v31, %v413_v29 }
  0x77   :  { %v408_v33 = vadd.f32 0.5, %v407_v30 }
  0x79   :  { %v418_v35 = vmul.f32 %v417_v32, %v408_v33 }
  0x7b   :  { %v419_v43 = vadd.f32 %v418_v35, %v416_v34 }
  0x7d   :  { %v421_v37 = vadd.f32 %v420_v36, %v419_v43 }
  0x7f   :  { %v422_v22 = vmul.f32 0.5, %v421_v37 }
  0x81   :  { %556 = vtanh.f32 %v422_v22 }
  0x87   :  { %v557_v38 = vpop.eup %556 }
  0x88   :  { %v424_v39 = vmul.f32 0.5, %v557_v38 }
  0x8a   :  { %v425_v40 = vadd.f32 0.5, %v424_v39 }
  0x8c   :  { %426 = vst [vmem:[#allocation7] sm:$0xff] %v425_v40 }
  0x8d   :  { %437 = dma.vmem_to_hbm [thread:$0]  %s433_s18, 128, %s435_s20, [#allocation4]  }
  0x8e   :  { %622 = dma.done.wait [#allocation4], 128  }
  0x8f   :  { %623 = vsyncadd [#allocation4], 4294967168 }
  0x90   :  { %442 = vsyncpa [#allocation3], 1 }
  0x91   :  { %443 = vsyncpa [#allocation4], 1 }
  0x92   :  { %444 = vsyncpa [#allocation5], 1 }

</bundles_post_ra>
